<compile_context>
chip_gen: v6e
topology: v6e:2x2x1
jax: 0.10.0
libtpu: 0.0.40
codegen_flags: <defaults>
</compile_context>

<pallas_src>
import functools

import jax
import jax.numpy as jnp
from jax.experimental import pallas as pl
from jax.experimental.pallas import tpu as pltpu


def _round_up(x, m):
    return ((x + m - 1) // m) * m


def _user_emb_kernel(idx_ref, tab_ref, out_ref, *, n_gender, n_age, n_occupation):
    idx = idx_ref[...]                          # [TB, 3] int32
    tb = idx.shape[0]
    n_rows = tab_ref.shape[0]                   # padded combined-table rows

    # Per-field row offsets inside the combined table; clamp each field to its
    # own table so OOB indices cannot bleed into a neighboring field's block.
    sel_g = jnp.clip(idx[:, 0:1], 0, n_gender - 1)                       # [TB, 1]
    sel_a = jnp.clip(idx[:, 1:2], 0, n_age - 1) + n_gender
    sel_o = jnp.clip(idx[:, 2:3], 0, n_occupation - 1) + (n_gender + n_age)

    # Single iota, three compares OR-ed -> combined one-hot with 3 ones/row.
    iota = jax.lax.broadcasted_iota(jnp.int32, (tb, n_rows), 1)
    onehot = ((iota == sel_g) | (iota == sel_a) | (iota == sel_o)).astype(
        jnp.float32
    )                                           # [TB, n_rows]

    # One MXU matmul produces the already-concatenated [TB, 3E] block.
    out_ref[...] = jnp.dot(
        onehot, tab_ref[...], preferred_element_type=jnp.float32
    )


def build_user_emb_table(gender_tab, age_tab, occ_tab):
    """Build the block-diagonal combined table once (outside the step fn)."""
    E = gender_tab.shape[1]
    n_g, n_a, n_o = gender_tab.shape[0], age_tab.shape[0], occ_tab.shape[0]
    n_rows = n_g + n_a + n_o
    rows_pad = _round_up(max(n_rows, 8), 8)     # sublane-aligned contraction
    cols = 3 * E

    tab = jnp.zeros((rows_pad, cols), jnp.float32)
    tab = tab.at[0:n_g, 0:E].set(gender_tab.astype(jnp.float32))
    tab = tab.at[n_g:n_g + n_a, E:2 * E].set(age_tab.astype(jnp.float32))
    tab = tab.at[n_g + n_a:n_rows, 2 * E:3 * E].set(occ_tab.astype(jnp.float32))
    return tab


def user_emb_forward(x_idx, combined_tab, *, n_gender, n_age, n_occupation,
                     block_b=2048):
    """x_idx: [B, 3] int32. Returns [B, 3*E] float32 = cat(gender|age|occ)."""
    B = x_idx.shape[0]
    rows_pad, cols = combined_tab.shape

    # Batch tiling: TB rows per grid step (multiple of 8). Keep >=2 grid steps
    # whenever B >= 16 so both v7x TensorCores get work on the parallel axis.
    TB = min(block_b, _round_up(max(B, 1), 8))
    if B >= 16:
        TB = min(TB, _round_up(-(-B // 2), 8))
    TB = _round_up(max(TB, 8), 8)
    B_pad = _round_up(B, TB)

    x_pad = x_idx.astype(jnp.int32)
    if B_pad != B:
        x_pad = jnp.pad(x_pad, ((0, B_pad - B), (0, 0)))

    grid = (B_pad // TB,)

    kernel = functools.partial(
        _user_emb_kernel,
        n_gender=n_gender, n_age=n_age, n_occupation=n_occupation,
    )

    out = pl.pallas_call(
        kernel,
        out_shape=jax.ShapeDtypeStruct((B_pad, cols), jnp.float32),
        grid_spec=pltpu.PrefetchScalarGridSpec(
            num_scalar_prefetch=0,
            grid=grid,
            in_specs=[
                pl.BlockSpec((TB, 3), lambda i: (i, 0)),            # indices
                pl.BlockSpec((rows_pad, cols), lambda i: (0, 0)),   # table
            ],
            out_specs=pl.BlockSpec((TB, cols), lambda i: (i, 0)),
        ),
        compiler_params=pltpu.CompilerParams(
            dimension_semantics=("parallel",),
        ),
    )(x_pad, combined_tab)

    if B_pad != B:
        out = out[:B]
    return out


def _reference(x_idx, gender_tab, age_tab, occ_tab):
    return jnp.concatenate(
        [gender_tab[x_idx[:, 0]], age_tab[x_idx[:, 1]], occ_tab[x_idx[:, 2]]],
        axis=1,
    )


if __name__ == "__main__":
    # Synthetic config (mirrors nn.Embedding shapes in __init__).
    embedding_size = 32
    n_gender, n_age, n_occupation = 2, 7, 21

    key = jax.random.PRNGKey(0)
    k_g, k_a, k_o, k_x = jax.random.split(key, 4)

    # nn.Embedding default init: N(0, 1).
    gender_tab = jax.random.normal(k_g, (n_gender, embedding_size), jnp.float32)
    age_tab = jax.random.normal(k_a, (n_age, embedding_size), jnp.float32)
    occ_tab = jax.random.normal(k_o, (n_occupation, embedding_size), jnp.float32)

    # Combined block-diagonal table built once, reused across forward calls.
    combined_tab = build_user_emb_table(gender_tab, age_tab, occ_tab)

    def make_x(k, B):
        kg, ka, ko = jax.random.split(k, 3)
        return jnp.stack(
            [
                jax.random.randint(kg, (B,), 0, n_gender, jnp.int32),
                jax.random.randint(ka, (B,), 0, n_age, jnp.int32),
                jax.random.randint(ko, (B,), 0, n_occupation, jnp.int32),
            ],
            axis=1,
        )

    fwd = functools.partial(
        user_emb_forward,
        n_gender=n_gender, n_age=n_age, n_occupation=n_occupation,
    )

    # Main run: B = 8.
    B = 8
    x_idx = make_x(k_x, B)
    out = jax.block_until_ready(fwd(x_idx, combined_tab))
    ref = _reference(x_idx, gender_tab, age_tab, occ_tab)
    assert out.shape == (B, 3 * embedding_size)
    assert jnp.allclose(out, ref, atol=1e-5), "mismatch vs reference (B=8)"

    # Second run: non-multiple-of-8 batch exercises the padding path.
    B2 = 11
    x_idx2 = make_x(jax.random.PRNGKey(1), B2)
    out2 = jax.block_until_ready(fwd(x_idx2, combined_tab))
    ref2 = _reference(x_idx2, gender_tab, age_tab, occ_tab)
    assert out2.shape == (B2, 3 * embedding_size)
    assert jnp.allclose(out2, ref2, atol=1e-5), "mismatch vs reference (B=11)"

    # Third run: larger batch exercises the multi-step parallel grid (2 TCs on v7x).
    B3 = 4096
    x_idx3 = make_x(jax.random.PRNGKey(2), B3)
    out3 = jax.block_until_ready(fwd(x_idx3, combined_tab))
    ref3 = _reference(x_idx3, gender_tab, age_tab, occ_tab)
    assert out3.shape == (B3, 3 * embedding_size)
    assert jnp.allclose(out3, ref3, atol=1e-5), "mismatch vs reference (B=4096)"

    print("KERNEL_OK")
</pallas_src>

<mosaic_0001>
module attributes {stable_mosaic.version = 11 : i64} {
  func.func @_user_emb_kernel(%arg0: i32, %arg1: memref<8x3xi32, #tpu.memory_space<vmem>>, %arg2: memref<32x96xf32, #tpu.memory_space<vmem>>, %arg3: memref<8x96xf32, #tpu.memory_space<vmem>>) attributes {dimension_semantics = [#tpu.dimension_semantics<parallel>], iteration_bounds = array<i64: 1>, scalar_prefetch = 0 : i64, scratch_operands = 0 : i64, tpu.core_type = #tpu.core_type<tc>, window_params = [{transform_indices = @transform_0, window_bounds = array<i64: 8, 3>}, {pipeline_mode = #tpu.pipeline_mode<synchronous>, transform_indices = @transform_1, window_bounds = array<i64: 32, 96>}, {transform_indices = @transform_2, window_bounds = array<i64: 8, 96>}]} {
    %c0 = arith.constant 0 : index
    %c0_0 = arith.constant 0 : index
    %0 = vector.load %arg1[%c0, %c0_0] : memref<8x3xi32, #tpu.memory_space<vmem>>, vector<8x3xi32>
    %1 = vector.extract_strided_slice %0 {offsets = [0, 0], sizes = [8, 1], strides = [1, 1]} : vector<8x3xi32> to vector<8x1xi32>
    %c0_i32 = arith.constant 0 : i32
    %c1_i32 = arith.constant 1 : i32
    %2 = vector.broadcast %c0_i32 : i32 to vector<8x1xi32>
    %3 = arith.maxsi %2, %1 : vector<8x1xi32>
    %4 = vector.broadcast %c1_i32 : i32 to vector<8x1xi32>
    %5 = arith.minsi %4, %3 : vector<8x1xi32>
    %6 = vector.extract_strided_slice %0 {offsets = [0, 1], sizes = [8, 1], strides = [1, 1]} : vector<8x3xi32> to vector<8x1xi32>
    %c0_i32_1 = arith.constant 0 : i32
    %c6_i32 = arith.constant 6 : i32
    %7 = vector.broadcast %c0_i32_1 : i32 to vector<8x1xi32>
    %8 = arith.maxsi %7, %6 : vector<8x1xi32>
    %9 = vector.broadcast %c6_i32 : i32 to vector<8x1xi32>
    %10 = arith.minsi %9, %8 : vector<8x1xi32>
    %c2_i32 = arith.constant 2 : i32
    %11 = vector.broadcast %c2_i32 : i32 to vector<8x1xi32>
    %12 = arith.addi %10, %11 : vector<8x1xi32>
    %13 = vector.extract_strided_slice %0 {offsets = [0, 2], sizes = [8, 1], strides = [1, 1]} : vector<8x3xi32> to vector<8x1xi32>
    %c0_i32_2 = arith.constant 0 : i32
    %c20_i32 = arith.constant 20 : i32
    %14 = vector.broadcast %c0_i32_2 : i32 to vector<8x1xi32>
    %15 = arith.maxsi %14, %13 : vector<8x1xi32>
    %16 = vector.broadcast %c20_i32 : i32 to vector<8x1xi32>
    %17 = arith.minsi %16, %15 : vector<8x1xi32>
    %c9_i32 = arith.constant 9 : i32
    %18 = vector.broadcast %c9_i32 : i32 to vector<8x1xi32>
    %19 = arith.addi %17, %18 : vector<8x1xi32>
    %20 = tpu.iota {dimensions = array<i32: 1>} : vector<8x32xi32>
    %21 = vector.broadcast %5 : vector<8x1xi32> to vector<8x32xi32>
    %22 = arith.cmpi eq, %20, %21 : vector<8x32xi32>
    %23 = vector.broadcast %12 : vector<8x1xi32> to vector<8x32xi32>
    %24 = arith.cmpi eq, %20, %23 : vector<8x32xi32>
    %25 = arith.ori %22, %24 : vector<8x32xi1>
    %26 = vector.broadcast %19 : vector<8x1xi32> to vector<8x32xi32>
    %27 = arith.cmpi eq, %20, %26 : vector<8x32xi32>
    %28 = arith.ori %25, %27 : vector<8x32xi1>
    %29 = arith.extui %28 : vector<8x32xi1> to vector<8x32xi32>
    %30 = arith.sitofp %29 : vector<8x32xi32> to vector<8x32xf32>
    %c0_3 = arith.constant 0 : index
    %c0_4 = arith.constant 0 : index
    %31 = vector.load %arg2[%c0_3, %c0_4] : memref<32x96xf32, #tpu.memory_space<vmem>>, vector<32x96xf32>
    %cst = arith.constant dense<0.000000e+00> : vector<8x96xf32>
    %32 = tpu.matmul %30, %31, %cst {dimension_numbers = #tpu.dot_dimension_numbers<[1], [0], [0], [1], [0, 0, 1, 1], [], []>} : vector<8x32xf32>, vector<32x96xf32>, vector<8x96xf32> -> vector<8x96xf32>
    %c0_5 = arith.constant 0 : index
    %c0_6 = arith.constant 0 : index
    %33 = vector.load %arg3[%c0_5, %c0_6] : memref<8x96xf32, #tpu.memory_space<vmem>>, vector<8x96xf32>
    tpu.vector_store %arg3[%c0_5, %c0_6], %32 {strides = array<i32>} : memref<8x96xf32, #tpu.memory_space<vmem>>, vector<8x96xf32>,
    return
  }
  func.func @transform_0(%arg0: i32) -> (i32, i32) {
    %c0_i32 = arith.constant 0 : i32
    %c0_i32_0 = arith.constant 0 : i32
    return %arg0, %c0_i32 : i32, i32
  }
  func.func @transform_1(%arg0: i32) -> (i32, i32) {
    %c0_i32 = arith.constant 0 : i32
    %c0_i32_0 = arith.constant 0 : i32
    %c0_i32_1 = arith.constant 0 : i32
    return %c0_i32, %c0_i32_0 : i32, i32
  }
  func.func @transform_2(%arg0: i32) -> (i32, i32) {
    %c0_i32 = arith.constant 0 : i32
    %c0_i32_0 = arith.constant 0 : i32
    return %arg0, %c0_i32 : i32, i32
  }
}

</mosaic_0001>

<bundles_post_ra>
// kernel: tpu_custom_call.1
= control target key start
LH: loop header
LB: loop body
LE: loop exit
PB: predicated region body
PF: predicated region fallthrough
CT: control target
= control target key end

     0   :  { %7 = vsyncpa [#allocation3], 0  ;;  %s258_s0 = inlined_call_operand.vmem [shape: s32[8,3], index: 0, kind: input, shape index: {}]   ;;  %s259_s1 = inlined_call_operand.hbm [shape: f32[32,96], index: 1, kind: input, shape index: {}]   ;;  %s260_s2 = inlined_call_operand.hbm [shape: f32[8,96], index: 2, kind: output, shape index: {}]  }
   0x1   :  { %8 = vsyncpa [#allocation4], 0  ;;  %s225_s9 = smov [#allocation2]  }
   0x2   :  { %s16_s10 = sshll.u32 %s225_s9, 4  ;;  %s17_s10 = int_to_ptr.vmem [resolvable:$true] %s16_s10 }
   0x3   :  { %s189_s11 = scalar_lea.vmem %s17_s10, 512  ;;  %p194_p1 = scmp.lt.s32.totalorder %s17_s10, %s17_s10 }
   0x4   :  { %p190_p0 = scmp.ne.s32.totalorder %s17_s10, %s189_s11  ;;  %p195_p2 = scmp.lt.s32.totalorder %s189_s11, %s189_s11 }
   0x6   :  { %p196_p3 = por %p195_p2, %p194_p1 }
   0x8   :  { %p197_p4 = pnand %p196_p3, %p190_p0 }
   0xa   :  { %200 = shalt.err (!%p197_p4)
}
   0xb   :  { %s226_s12 = smov 128   ;;  %s227_s13 = smov 8  }
   0xc   :  { %22 = dma.hbm_to_vmem [thread:$0]  %s259_s1, 512, %s17_s10, [#allocation3], %s226_s12, %s226_s12, %s227_s13  }
   0xd   :  { %221 = dma.done.wait [#allocation3], 512  }
   0xe   :  { %222 = vsyncadd [#allocation3], 4294966784  ;;  %v228_v0 = vmov 0   ;;  %v229_v1 = vmov 2   ;;  %v26_v2 = vld [vmem:[%s258_s0] sm:$0xff]  ;;  %v58_v3 = vld [vmem:[#allocation2 + $0x18] sm:$0xff]  ;;  %v37_v15 = vlaneseq }
   0xf   :  { %177 = vset.pattern.permute.xlu0 %v228_v0  ;;  %179 = vset.pattern.permute.xlu1 %v229_v1  ;;  %vm27_vm0 = vcmp.gt.s32.totalorder %v26_v2, 0  ;;  %v230_v5 = vmov 0.0   ;;  %v57_v6 = vld [vmem:[#allocation2 + $0x10] sm:$0xff]  ;;  %v56_v12 = vld [vmem:[#allocation2 + $0x8] sm:$0xff]  ;;  %v55_v13 = vld [vmem:[#allocation2] sm:$0xff]  ;;  %v231_v14 = vmov 1  }
  0x10   :  { %v28_v4 = vsel %vm27_vm0, %v26_v2, 0  ;;  %157 = vmatprep.subr.mxu0 %v230_v5  ;;  %vm232_vm4 = vmmov 0   ;;  %v38_v17 = vand.u32 127, %v37_v15  ;;  %vm59_vm9 = vcmask 261120   ;;  %s233_s0 = smov [#allocation5]  }
  0x11   :  { %vm29_vm1 = vcmp.lt.s32.totalorder %v28_v4, 1  ;;  %vm31_vm2 = vcmp.lt.s32.totalorder %v28_v4, 6  ;;  %vm34_vm3 = vcmp.lt.s32.totalorder %v28_v4, 20  ;;  %158 = vmatpush3.msra.mxu0 %v58_v3  ;;  %165 = vmatprep.mubr.msk.f32.mxu0 %vm232_vm4, %v230_v5  ;;  %s141_s1 = sshll.u32 %s233_s0, 4  ;;  %vm133_vm11 = vcmask 785408   ;;  %s142_s1 = int_to_ptr.vmem [resolvable:$true] %s141_s1 }
  0x12   :  { %v30_v7 = vsel %vm29_vm1, %v28_v4, 1  ;;  %v32_v8 = vsel %vm31_vm2, %v28_v4, 6  ;;  %v35_v9 = vsel %vm34_vm3, %v28_v4, 20  ;;  %159 = vmatprep.subr.mxu0 %v230_v5  ;;  %s201_s18 = scalar_lea.vmem %s142_s1, 128  ;;  %p206_p6 = scmp.lt.s32.totalorder %s142_s1, %s142_s1 }
  0x13   :  { %40 = vperm.xlu0 %177, %v30_v7   ;;  %v36_v10 = vadd.s32 9, %v35_v9  ;;  %160 = vmatpush3.msra.mxu0 %v57_v6  ;;  %v33_v11 = vadd.s32 2, %v32_v8  ;;  %p202_p5 = scmp.ne.s32.totalorder %s142_s1, %s201_s18  ;;  %p207_p7 = scmp.lt.s32.totalorder %s201_s18, %s201_s18 }
  0x14   :  { %161 = vmatprep.subr.mxu0 %v230_v5 }
  0x15   :  { %49 = vperm.xlu1 %179, %v36_v10   ;;  %162 = vmatpush3.msra.mxu0 %v56_v12  ;;  %p208_p8 = por %p207_p7, %p206_p6 }
  0x16   :  { %163 = vmatprep.subr.mxu0 %v230_v5 }
  0x17   :  { %178 = vset.pattern.permute.xlu0 %v231_v14  ;;  %164 = vmatpush3.msra.mxu0 %v55_v13  ;;  %p209_p9 = pnand %p208_p8, %p202_p5 }
  0x18   :  { %44 = vperm.xlu0 %178, %v33_v11  }
  0x1c   :  { %180 = vset.pattern.permute.xlu0 %v229_v1 }
  0x8e   :  { %v41_v16 = vpop.permute.xlu0 %40 }
  0x8f   :  { %vm42_vm6 = vcmp.eq.s32.totalorder %v38_v17, %v41_v16 }
  0x90   :  { %v50_v18 = vpop.permute.xlu1 %49 }
  0x91   :  { %vm51_vm5 = vcmp.eq.s32.totalorder %v38_v17, %v50_v18 }
  0x93   :  { %v45_v19 = vpop.permute.xlu0 %44 }
  0x94   :  { %vm46_vm7 = vcmp.eq.s32.totalorder %v38_v17, %v45_v19 }
  0x95   :  { %vm47_vm8 = vmor %vm42_vm6, %vm46_vm7 }
  0x96   :  { %vm52_vm10 = vmor %vm47_vm8, %vm51_vm5 }
  0x97   :  { %v150_v20 = vsel %vm52_vm10, 1.0, %v230_v5 }
  0x98   :  { %166 = vmatmul.mubr.msk.f32.vlgmr.msra.gmra.mxu0 %vm59_vm9, %v150_v20 }
 0x158   :  { %v129_v21 = vpop.f32.mrf.mxu0 }
 0x159   :  { %134 = vst.msk [vmem:[#allocation5] sm:$0xff] %vm133_vm11, %v129_v21 }
 0x15a   :  { %v167_v22 = vpop.f32.mrf.mxu0 }
 0x15b   :  { %212 = shalt.err (!%p209_p9)
}
 0x15c   :  { %144 = dma.vmem_to_hbm [thread:$0]  %s142_s1, 128, %s260_s2, [#allocation4]  }
 0x15d   :  { %223 = dma.done.wait [#allocation4], 128  }
 0x15e   :  { %224 = vsyncadd [#allocation4], 4294967168 }
 0x15f   :  { %148 = vsyncpa [#allocation3], 1 }
 0x160   :  { %149 = vsyncpa [#allocation4], 1 }

</bundles_post_ra>
